<compile_context>
chip_gen: v5e
topology: v5e:2x2
jax: 0.10.0
libtpu: 0.0.40
codegen_flags: <defaults>
</compile_context>

<pallas_src>
import jax
import jax.numpy as jnp
from jax.experimental import pallas as pl
from jax.experimental.pallas import tpu as pltpu

EPS = 1e-5


def _cbn_kernel(p_ref, x_ref, o_ref):
    """Complex BatchNorm over one channel block.

    p_ref : (c_tile, 4) f32   columns = [gamma_r, beta_r, gamma_i, beta_i]
    x_ref : (N, c_tile, 2*HW) f32, lane-interleaved [re, im, re, im, ...]
    o_ref : same layout as x_ref
    """
    n, ct, hw2 = x_ref.shape
    inv_count = 1.0 / float(n * (hw2 // 2))

    # Lane-parity mask, hoisted once per grid step: even lane -> real part,
    # odd lane -> imaginary part.
    lane = jax.lax.broadcasted_iota(jnp.int32, (ct, hw2), 1)
    is_imag = (lane & 1) == 1

    def batch_loop(step, init):
        # n is static: unroll small batches (typical), fori_loop for large ones
        # to keep code size bounded.
        if n <= 16:
            acc = init
            for i in range(n):
                acc = step(i, acc)
            return acc
        return jax.lax.fori_loop(0, n, step, init)

    zeros_row = jnp.zeros((ct, hw2), jnp.float32)

    # Pass 1: per-channel, per-part means via masked cross-lane reductions.
    # Only (ct, hw2)-sized temporaries are live; the (N, ct, hw2) tile is only
    # ever read row-by-row from the pipelined VMEM buffer.
    s = batch_loop(lambda i, acc: acc + x_ref[i], zeros_row)
    mean_r = jnp.sum(jnp.where(is_imag, 0.0, s), axis=-1, keepdims=True) * inv_count
    mean_i = jnp.sum(jnp.where(is_imag, s, 0.0), axis=-1, keepdims=True) * inv_count
    mean_lane = jnp.where(is_imag, mean_i, mean_r)                 # (ct, hw2)

    # Pass 2: centered, biased variance (avoids E[x^2]-mean^2 cancellation).
    def sq_step(i, acc):
        d = x_ref[i] - mean_lane
        return acc + d * d

    ds = batch_loop(sq_step, zeros_row)
    var_r = jnp.sum(jnp.where(is_imag, 0.0, ds), axis=-1, keepdims=True) * inv_count
    var_i = jnp.sum(jnp.where(is_imag, ds, 0.0), axis=-1, keepdims=True) * inv_count

    # Fold gamma/beta into one per-channel, per-part scale/shift.
    p = p_ref[...]
    gamma_r, beta_r = p[:, 0:1], p[:, 1:2]
    gamma_i, beta_i = p[:, 2:3], p[:, 3:4]
    scale_r = jax.lax.rsqrt(jnp.maximum(var_r, 0.0) + EPS) * gamma_r
    scale_i = jax.lax.rsqrt(jnp.maximum(var_i, 0.0) + EPS) * gamma_i
    shift_r = beta_r - mean_r * scale_r
    shift_i = beta_i - mean_i * scale_i
    scale_lane = jnp.where(is_imag, scale_i, scale_r)              # (ct, hw2)
    shift_lane = jnp.where(is_imag, shift_i, shift_r)              # (ct, hw2)

    # Pass 3: one fused multiply-add per element, lane-dense interleaved store.
    def norm_step(i, carry):
        o_ref[i] = x_ref[i] * scale_lane + shift_lane
        return carry

    batch_loop(norm_step, 0)


def _vmem_budget_bytes():
    """Scoped VMEM limit: half of physical, capped at 64 MiB.

    -> 64 MiB on 128 MiB parts (v5e/v6e), 32 MiB on v7x's 64 MiB part.
    """
    physical = 128 * 1024 * 1024
    try:
        info = pltpu.get_tpu_info()
        physical = int(getattr(info, "vmem_capacity_bytes", physical))
    except Exception:
        pass
    return min(physical // 2, 64 * 1024 * 1024)


def _pick_c_tile(n, c, hw2, budget_bytes):
    """Channel tile that (a) fits the budget including in-kernel temporaries,
    (b) targets ~4 grid steps so the double-buffered pipeline and both v7x
    TensorCores stay busy, while (c) keeping each input-stream tile >= ~1 MiB
    so the ~0.35 us/step overhead stays negligible."""
    row_bytes = hw2 * 4                            # one (1, hw2) f32 row
    per_c_io = 4 * n * row_bytes                   # in + out blocks, double-buffered
    per_c_tmp = 8 * row_bytes                      # mask + lane vectors + reduce temps
    vmem_cap = max(1, (budget_bytes * 9 // 10) // (per_c_io + per_c_tmp))

    one_mib_c = max(1, pl.cdiv(1 << 20, n * row_bytes))   # channels per ~1 MiB stream
    desired = max(one_mib_c, pl.cdiv(c, 4))               # aim for ~4 grid steps

    c_tile = min(c, vmem_cap, desired)

    if c_tile >= c:
        # Whole channel extent fits in one step.  Avoid collapsing the grid to
        # a single step (idles one v7x TensorCore, no DMA overlap) whenever a
        # >=2-way split still gives legal (multiple-of-8) decent-size tiles.
        if c >= 16 and n * row_bytes * (c // 2) >= (256 << 10):
            return (pl.cdiv(c, 2) // 8) * 8
        return c  # full extent -> exempt from the multiple-of-8 sublane rule

    if c_tile >= 8:
        return (c_tile // 8) * 8                   # partial tiles: multiple of 8

    # TODO(synk): HW-axis tiling needed here; an 8-channel block may overflow
    # VMEM for very large N*H*W.
    return min(8, c)


def _complex_to_interleaved_f32(x):
    """complex64 (...,) -> float32 (..., 2) interleaved [re, im].

    Free bitcast when the installed JAX supports complex bitcasts; otherwise a
    single stack pass producing the same layout."""
    try:
        return jax.lax.bitcast_convert_type(x, jnp.float32)
    except (TypeError, NotImplementedError, ValueError):
        return jnp.stack([jnp.real(x), jnp.imag(x)], axis=-1).astype(jnp.float32)


def _interleaved_f32_to_complex(y):
    """float32 (..., 2) interleaved [re, im] -> complex64 (...,)."""
    try:
        return jax.lax.bitcast_convert_type(y, jnp.complex64)
    except (TypeError, NotImplementedError, ValueError):
        return jax.lax.complex(y[..., 0], y[..., 1])


def complex_batchnorm2d(x, gamma_r, beta_r, gamma_i, beta_i):
    """x: (N, C, H, W) complex64. Returns (N, C, H, W) complex64."""
    N, C, H, W = x.shape
    HW2 = 2 * H * W

    # Single interleaved float32 slab; contiguous reshape only.
    x_f32 = _complex_to_interleaved_f32(x).reshape(N, C, HW2)

    # One packed (C, 4) parameter slab -> one tiny DMA per grid step.
    params = jnp.stack(
        [gamma_r, beta_r, gamma_i, beta_i], axis=-1
    ).astype(jnp.float32)

    budget = _vmem_budget_bytes()
    c_tile = _pick_c_tile(N, C, HW2, budget)
    grid = (pl.cdiv(C, c_tile),)

    x_spec = pl.BlockSpec((N, c_tile, HW2), lambda i: (0, i, 0))
    p_spec = pl.BlockSpec((c_tile, 4), lambda i: (i, 0))

    out = pl.pallas_call(
        _cbn_kernel,
        out_shape=jax.ShapeDtypeStruct((N, C, HW2), jnp.float32),
        grid=grid,
        in_specs=[p_spec, x_spec],
        out_specs=x_spec,
        compiler_params=pltpu.CompilerParams(
            dimension_semantics=("parallel",),
            vmem_limit_bytes=budget,
        ),
    )(params, x_f32)

    return _interleaved_f32_to_complex(out.reshape(N, C, H, W, 2))


def _reference(x, gamma_r, beta_r, gamma_i, beta_i):
    def bn(a, g, b):
        mean = jnp.mean(a, axis=(0, 2, 3), keepdims=True)
        var = jnp.mean((a - mean) ** 2, axis=(0, 2, 3), keepdims=True)
        return (a - mean) / jnp.sqrt(var + EPS) * g[None, :, None, None] \
            + b[None, :, None, None]

    return jax.lax.complex(
        bn(jnp.real(x), gamma_r, beta_r),
        bn(jnp.imag(x), gamma_i, beta_i),
    )


if __name__ == "__main__":
    key = jax.random.PRNGKey(0)
    N, C, H, W = 2, 4, 16, 16
    kr, ki = jax.random.split(key)
    x_real = jax.random.normal(kr, (N, C, H, W), dtype=jnp.float32)
    x_imag = jax.random.normal(ki, (N, C, H, W), dtype=jnp.float32)
    x = jax.lax.complex(x_real, x_imag)  # complex64

    # BatchNorm2d default parameter init: weight=1, bias=0 (deterministic).
    gamma_r = jnp.ones((C,), jnp.float32)
    beta_r = jnp.zeros((C,), jnp.float32)
    gamma_i = jnp.ones((C,), jnp.float32)
    beta_i = jnp.zeros((C,), jnp.float32)

    out = complex_batchnorm2d(x, gamma_r, beta_r, gamma_i, beta_i)
    out = jax.block_until_ready(out)

    ref = _reference(x, gamma_r, beta_r, gamma_i, beta_i)
    assert out.shape == x.shape and out.dtype == jnp.complex64
    assert jnp.allclose(jnp.real(out), jnp.real(ref), atol=1e-5, rtol=1e-5)
    assert jnp.allclose(jnp.imag(out), jnp.imag(ref), atol=1e-5, rtol=1e-5)

    print("KERNEL_OK")
</pallas_src>

<mosaic_0001>
module attributes {stable_mosaic.version = 11 : i64} {
  func.func @_cbn_kernel(%arg0: i32, %arg1: memref<4x4xf32, #tpu.memory_space<vmem>>, %arg2: memref<2x4x512xf32, #tpu.memory_space<vmem>>, %arg3: memref<2x4x512xf32, #tpu.memory_space<vmem>>) attributes {dimension_semantics = [#tpu.dimension_semantics<parallel>], iteration_bounds = array<i64: 1>, scalar_prefetch = 0 : i64, scratch_operands = 0 : i64, tpu.core_type = #tpu.core_type<tc>, window_params = [{transform_indices = @transform_0, window_bounds = array<i64: 4, 4>}, {transform_indices = @transform_1, window_bounds = array<i64: 2, 4, 512>}, {transform_indices = @transform_2, window_bounds = array<i64: 2, 4, 512>}]} {
    %0 = tpu.iota {dimensions = array<i32: 1>} : vector<4x512xi32>
    %c1_i32 = arith.constant 1 : i32
    %1 = vector.broadcast %c1_i32 : i32 to vector<4x512xi32>
    %2 = arith.andi %0, %1 : vector<4x512xi32>
    %c1_i32_0 = arith.constant 1 : i32
    %3 = vector.broadcast %c1_i32_0 : i32 to vector<4x512xi32>
    %4 = arith.cmpi eq, %2, %3 : vector<4x512xi32>
    %cst = arith.constant 0.000000e+00 : f32
    %5 = vector.broadcast %cst : f32 to vector<4x512xf32>
    %c0 = arith.constant 0 : index
    %c0_1 = arith.constant 0 : index
    %c0_2 = arith.constant 0 : index
    %6 = vector.load %arg2[%c0, %c0_1, %c0_2] : memref<2x4x512xf32, #tpu.memory_space<vmem>>, vector<1x4x512xf32>
    %7 = vector.shape_cast %6 : vector<1x4x512xf32> to vector<4x512xf32>
    %8 = arith.addf %5, %7 : vector<4x512xf32>
    %c1 = arith.constant 1 : index
    %c0_3 = arith.constant 0 : index
    %c0_4 = arith.constant 0 : index
    %9 = vector.load %arg2[%c1, %c0_3, %c0_4] : memref<2x4x512xf32, #tpu.memory_space<vmem>>, vector<1x4x512xf32>
    %10 = vector.shape_cast %9 : vector<1x4x512xf32> to vector<4x512xf32>
    %11 = arith.addf %8, %10 : vector<4x512xf32>
    %cst_5 = arith.constant 0.000000e+00 : f32
    %12 = vector.broadcast %cst_5 : f32 to vector<4x512xf32>
    %13 = arith.select %4, %12, %11 : vector<4x512xi1>, vector<4x512xf32>
    %cst_6 = arith.constant dense<0.000000e+00> : vector<4xf32>
    %14 = vector.multi_reduction <add>, %13, %cst_6 [1] : vector<4x512xf32> to vector<4xf32>
    %15 = vector.shape_cast %14 : vector<4xf32> to vector<4x1xf32>
    %cst_7 = arith.constant 0.001953125 : f32
    %16 = vector.broadcast %cst_7 : f32 to vector<4x1xf32>
    %17 = arith.mulf %15, %16 : vector<4x1xf32>
    %cst_8 = arith.constant 0.000000e+00 : f32
    %18 = vector.broadcast %cst_8 : f32 to vector<4x512xf32>
    %19 = arith.select %4, %11, %18 : vector<4x512xi1>, vector<4x512xf32>
    %cst_9 = arith.constant dense<0.000000e+00> : vector<4xf32>
    %20 = vector.multi_reduction <add>, %19, %cst_9 [1] : vector<4x512xf32> to vector<4xf32>
    %21 = vector.shape_cast %20 : vector<4xf32> to vector<4x1xf32>
    %cst_10 = arith.constant 0.001953125 : f32
    %22 = vector.broadcast %cst_10 : f32 to vector<4x1xf32>
    %23 = arith.mulf %21, %22 : vector<4x1xf32>
    %24 = vector.shape_cast %23 : vector<4x1xf32> to vector<4x1xf32>
    %25 = vector.broadcast %24 : vector<4x1xf32> to vector<4x512xf32>
    %26 = vector.shape_cast %17 : vector<4x1xf32> to vector<4x1xf32>
    %27 = vector.broadcast %26 : vector<4x1xf32> to vector<4x512xf32>
    %28 = arith.select %4, %25, %27 : vector<4x512xi1>, vector<4x512xf32>
    %c0_11 = arith.constant 0 : index
    %c0_12 = arith.constant 0 : index
    %c0_13 = arith.constant 0 : index
    %29 = vector.load %arg2[%c0_11, %c0_12, %c0_13] : memref<2x4x512xf32, #tpu.memory_space<vmem>>, vector<1x4x512xf32>
    %30 = vector.shape_cast %29 : vector<1x4x512xf32> to vector<4x512xf32>
    %31 = arith.subf %30, %28 : vector<4x512xf32>
    %32 = arith.mulf %31, %31 : vector<4x512xf32>
    %33 = arith.addf %5, %32 : vector<4x512xf32>
    %c1_14 = arith.constant 1 : index
    %c0_15 = arith.constant 0 : index
    %c0_16 = arith.constant 0 : index
    %34 = vector.load %arg2[%c1_14, %c0_15, %c0_16] : memref<2x4x512xf32, #tpu.memory_space<vmem>>, vector<1x4x512xf32>
    %35 = vector.shape_cast %34 : vector<1x4x512xf32> to vector<4x512xf32>
    %36 = arith.subf %35, %28 : vector<4x512xf32>
    %37 = arith.mulf %36, %36 : vector<4x512xf32>
    %38 = arith.addf %33, %37 : vector<4x512xf32>
    %cst_17 = arith.constant 0.000000e+00 : f32
    %39 = vector.broadcast %cst_17 : f32 to vector<4x512xf32>
    %40 = arith.select %4, %39, %38 : vector<4x512xi1>, vector<4x512xf32>
    %cst_18 = arith.constant dense<0.000000e+00> : vector<4xf32>
    %41 = vector.multi_reduction <add>, %40, %cst_18 [1] : vector<4x512xf32> to vector<4xf32>
    %42 = vector.shape_cast %41 : vector<4xf32> to vector<4x1xf32>
    %cst_19 = arith.constant 0.001953125 : f32
    %43 = vector.broadcast %cst_19 : f32 to vector<4x1xf32>
    %44 = arith.mulf %42, %43 : vector<4x1xf32>
    %cst_20 = arith.constant 0.000000e+00 : f32
    %45 = vector.broadcast %cst_20 : f32 to vector<4x512xf32>
    %46 = arith.select %4, %38, %45 : vector<4x512xi1>, vector<4x512xf32>
    %cst_21 = arith.constant dense<0.000000e+00> : vector<4xf32>
    %47 = vector.multi_reduction <add>, %46, %cst_21 [1] : vector<4x512xf32> to vector<4xf32>
    %48 = vector.shape_cast %47 : vector<4xf32> to vector<4x1xf32>
    %cst_22 = arith.constant 0.001953125 : f32
    %49 = vector.broadcast %cst_22 : f32 to vector<4x1xf32>
    %50 = arith.mulf %48, %49 : vector<4x1xf32>
    %c0_23 = arith.constant 0 : index
    %c0_24 = arith.constant 0 : index
    %51 = vector.load %arg1[%c0_23, %c0_24] : memref<4x4xf32, #tpu.memory_space<vmem>>, vector<4x4xf32>
    %52 = vector.extract_strided_slice %51 {offsets = [0, 0], sizes = [4, 1], strides = [1, 1]} : vector<4x4xf32> to vector<4x1xf32>
    %53 = vector.extract_strided_slice %51 {offsets = [0, 1], sizes = [4, 1], strides = [1, 1]} : vector<4x4xf32> to vector<4x1xf32>
    %54 = vector.extract_strided_slice %51 {offsets = [0, 2], sizes = [4, 1], strides = [1, 1]} : vector<4x4xf32> to vector<4x1xf32>
    %55 = vector.extract_strided_slice %51 {offsets = [0, 3], sizes = [4, 1], strides = [1, 1]} : vector<4x4xf32> to vector<4x1xf32>
    %cst_25 = arith.constant 0.000000e+00 : f32
    %56 = vector.broadcast %cst_25 : f32 to vector<4x1xf32>
    %57 = arith.maximumf %44, %56 : vector<4x1xf32>
    %cst_26 = arith.constant 9.99999974E-6 : f32
    %58 = vector.broadcast %cst_26 : f32 to vector<4x1xf32>
    %59 = arith.addf %57, %58 : vector<4x1xf32>
    %60 = math.rsqrt %59 : vector<4x1xf32>
    %61 = arith.mulf %60, %52 : vector<4x1xf32>
    %cst_27 = arith.constant 0.000000e+00 : f32
    %62 = vector.broadcast %cst_27 : f32 to vector<4x1xf32>
    %63 = arith.maximumf %50, %62 : vector<4x1xf32>
    %cst_28 = arith.constant 9.99999974E-6 : f32
    %64 = vector.broadcast %cst_28 : f32 to vector<4x1xf32>
    %65 = arith.addf %63, %64 : vector<4x1xf32>
    %66 = math.rsqrt %65 : vector<4x1xf32>
    %67 = arith.mulf %66, %54 : vector<4x1xf32>
    %68 = arith.mulf %17, %61 : vector<4x1xf32>
    %69 = arith.subf %53, %68 : vector<4x1xf32>
    %70 = arith.mulf %23, %67 : vector<4x1xf32>
    %71 = arith.subf %55, %70 : vector<4x1xf32>
    %72 = vector.shape_cast %67 : vector<4x1xf32> to vector<4x1xf32>
    %73 = vector.broadcast %72 : vector<4x1xf32> to vector<4x512xf32>
    %74 = vector.shape_cast %61 : vector<4x1xf32> to vector<4x1xf32>
    %75 = vector.broadcast %74 : vector<4x1xf32> to vector<4x512xf32>
    %76 = arith.select %4, %73, %75 : vector<4x512xi1>, vector<4x512xf32>
    %77 = vector.shape_cast %71 : vector<4x1xf32> to vector<4x1xf32>
    %78 = vector.broadcast %77 : vector<4x1xf32> to vector<4x512xf32>
    %79 = vector.shape_cast %69 : vector<4x1xf32> to vector<4x1xf32>
    %80 = vector.broadcast %79 : vector<4x1xf32> to vector<4x512xf32>
    %81 = arith.select %4, %78, %80 : vector<4x512xi1>, vector<4x512xf32>
    %c0_29 = arith.constant 0 : index
    %c0_30 = arith.constant 0 : index
    %c0_31 = arith.constant 0 : index
    %82 = vector.load %arg2[%c0_29, %c0_30, %c0_31] : memref<2x4x512xf32, #tpu.memory_space<vmem>>, vector<1x4x512xf32>
    %83 = vector.shape_cast %82 : vector<1x4x512xf32> to vector<4x512xf32>
    %84 = arith.mulf %83, %76 : vector<4x512xf32>
    %85 = arith.addf %84, %81 : vector<4x512xf32>
    %c0_32 = arith.constant 0 : index
    %c0_33 = arith.constant 0 : index
    %c0_34 = arith.constant 0 : index
    %86 = vector.load %arg3[%c0_32, %c0_33, %c0_34] : memref<2x4x512xf32, #tpu.memory_space<vmem>>, vector<1x4x512xf32>
    %87 = vector.shape_cast %86 : vector<1x4x512xf32> to vector<4x512xf32>
    %88 = vector.shape_cast %85 : vector<4x512xf32> to vector<1x4x512xf32>
    tpu.vector_store %arg3[%c0_32, %c0_33, %c0_34], %88 {strides = array<i32>} : memref<2x4x512xf32, #tpu.memory_space<vmem>>, vector<1x4x512xf32>,
    %c1_35 = arith.constant 1 : index
    %c0_36 = arith.constant 0 : index
    %c0_37 = arith.constant 0 : index
    %89 = vector.load %arg2[%c1_35, %c0_36, %c0_37] : memref<2x4x512xf32, #tpu.memory_space<vmem>>, vector<1x4x512xf32>
    %90 = vector.shape_cast %89 : vector<1x4x512xf32> to vector<4x512xf32>
    %91 = arith.mulf %90, %76 : vector<4x512xf32>
    %92 = arith.addf %91, %81 : vector<4x512xf32>
    %c1_38 = arith.constant 1 : index
    %c0_39 = arith.constant 0 : index
    %c0_40 = arith.constant 0 : index
    %93 = vector.load %arg3[%c1_38, %c0_39, %c0_40] : memref<2x4x512xf32, #tpu.memory_space<vmem>>, vector<1x4x512xf32>
    %94 = vector.shape_cast %93 : vector<1x4x512xf32> to vector<4x512xf32>
    %95 = vector.shape_cast %92 : vector<4x512xf32> to vector<1x4x512xf32>
    tpu.vector_store %arg3[%c1_38, %c0_39, %c0_40], %95 {strides = array<i32>} : memref<2x4x512xf32, #tpu.memory_space<vmem>>, vector<1x4x512xf32>,
    return
  }
  func.func @transform_0(%arg0: i32) -> (i32, i32) {
    %c0_i32 = arith.constant 0 : i32
    %c0_i32_0 = arith.constant 0 : i32
    return %arg0, %c0_i32 : i32, i32
  }
  func.func @transform_1(%arg0: i32) -> (i32, i32, i32) {
    %c0_i32 = arith.constant 0 : i32
    %c0_i32_0 = arith.constant 0 : i32
    %c0_i32_1 = arith.constant 0 : i32
    return %c0_i32, %arg0, %c0_i32_0 : i32, i32, i32
  }
  func.func @transform_2(%arg0: i32) -> (i32, i32, i32) {
    %c0_i32 = arith.constant 0 : i32
    %c0_i32_0 = arith.constant 0 : i32
    %c0_i32_1 = arith.constant 0 : i32
    return %c0_i32, %arg0, %c0_i32_0 : i32, i32, i32
  }
}

</mosaic_0001>

<bundles_post_ra>
// kernel: tpu_custom_call.1
= control target key start
LH: loop header
LB: loop body
LE: loop exit
PB: predicated region body
PF: predicated region fallthrough
CT: control target
= control target key end

     0   :  { %7 = vsyncpa [#allocation3], 0  ;;  %s582_s0 = inlined_call_operand.hbm [shape: f32[4,4], index: 0, kind: input, shape index: {}]   ;;  %s583_s1 = inlined_call_operand.hbm [shape: f32[2,4,512], index: 1, kind: input, shape index: {}]   ;;  %s584_s2 = inlined_call_operand.hbm [shape: f32[2,4,512], index: 2, kind: output, shape index: {}]  }
   0x1   :  { %8 = vsyncpa [#allocation6], 0 }
   0x2   :  { %9 = vsyncpa [#allocation4], 0  ;;  %s15_s11 = sshll.u32 %s582_s0, 4  ;;  %s414_s12 = smov [#allocation2]   ;;  %s16_s11 = int_to_ptr.hbm [resolvable:$true] %s15_s11 }
   0x3   :  { %s17_s13 = sshll.u32 %s414_s12, 4  ;;  %s25_s16 = sshll.u32 %s583_s1, 4  ;;  %s18_s13 = int_to_ptr.vmem [resolvable:$true] %s17_s13  ;;  %s26_s16 = int_to_ptr.hbm [resolvable:$true] %s25_s16 }
   0x4   :  { %20 = dma.hbm_to_vmem [thread:$0]  %s16_s11, 64, %s18_s13, [#allocation3]  }
   0x5   :  { %s415_s17 = smov [#allocation5]   ;;  %s416_s19 = smov 256  }
   0x6   :  { %s27_s18 = sshll.u32 %s415_s17, 4  ;;  %s417_s20 = smov 16   ;;  %s28_s18 = int_to_ptr.vmem [resolvable:$true] %s27_s18 }
   0x7   :  { %33 = dma.hbm_to_vmem [thread:$0]  %s26_s16, 512, %s28_s18, [#allocation6], %s416_s19, %s416_s19, %s417_s20  }
   0x8   :  { %408 = dma.done.wait [#allocation3], 64  }
   0x9   :  { %409 = vsyncadd [#allocation3], 4294967232 }
   0xa   :  { %410 = dma.done.wait [#allocation6], 512  }
   0xb   :  { %411 = vsyncadd [#allocation6], 4294966784  ;;  %v42_v0 = vlaneseq  ;;  %v448_v2 = vld [vmem:[#allocation5] sm:$0xff]  ;;  %v450_v3 = vld [vmem:[#allocation5 + $0x8] sm:$0xff]  ;;  %vm81_vm0 = vcmask 1043456   ;;  %s420_s0 = smov 1  }
   0xc   :  { %v452_v4 = vld [vmem:[#allocation5 + $0x10] sm:$0xff]  ;;  %v454_v8 = vld [vmem:[#allocation5 + $0x18] sm:$0xff]  ;;  %s423_s1 = smov [#allocation7]   ;;  %s303_s24 = sshll.u32 %s584_s2, 4  ;;  %s304_s24 = int_to_ptr.hbm [resolvable:$true] %s303_s24 }
   0xd   :  { %v43_v1 = vand.u32 127, %v42_v0  ;;  %v62_v9 = vadd.f32 %v452_v4, %v448_v2  ;;  %v63_v10 = vadd.f32 %v454_v8, %v450_v3  ;;  %s301_s21 = sshll.u32 %s423_s1, 4  ;;  %s302_s21 = int_to_ptr.vmem [resolvable:$true] %s301_s21 }
   0xf   :  { %v44_v5 = vadd.s32 128, %v43_v1  ;;  %v45_v6 = vadd.s32 256, %v43_v1  ;;  %v46_v7 = vadd.s32 384, %v43_v1  ;;  %66 = vst [vmem:[#allocation1] ss:$2 sm:$0xff] %v62_v9  ;;  %v47_v11 = vand.u32 1, %v43_v1 }
  0x10   :  { %68 = vst [vmem:[#allocation1 + $0x10] ss:$2 sm:$0xff] %v63_v10 }
  0x11   :  { %v48_v12 = vand.u32 1, %v44_v5  ;;  %v49_v13 = vand.u32 1, %v45_v6  ;;  %v50_v14 = vand.u32 1, %v46_v7  ;;  %vm460_vm1 = vcmp.eq.s32.totalorder %v47_v11, 1 }
  0x13   :  { %vm464_vm2 = vcmp.eq.s32.totalorder %v48_v12, 1  ;;  %vm468_vm3 = vcmp.eq.s32.totalorder %v49_v13, 1  ;;  %vm472_vm4 = vcmp.eq.s32.totalorder %v50_v14, 1 }
  0x16   :  { %v69_v19 = vld.sshfl [vmem:[#allocation1] sm:$0xff pattern:$0x75316420]  ;;  %v70_v20 = vld.sshfl [vmem:[#allocation1 + $0x8] sm:$0xff pattern:$0x75316420] }
  0x17   :  { %v71_v21 = vld.sshfl [vmem:[#allocation1 + $0x10] sm:$0xff pattern:$0x75316420]  ;;  %v72_v22 = vld.sshfl [vmem:[#allocation1 + $0x18] sm:$0xff pattern:$0x75316420] }
  0x18   :  { %v77_v23 = vsel %vm460_vm1, 0.0, %v69_v19  ;;  %v78_v24 = vsel %vm464_vm2, 0.0, %v70_v20  ;;  %v79_v25 = vsel %vm468_vm3, 0.0, %v71_v21  ;;  %v80_v26 = vsel %vm472_vm4, 0.0, %v72_v22  ;;  %92 = vst [vmem:[#allocation1] ss:$2 sm:$0xff] %v62_v9 }
  0x19   :  { %v82_v27 = vsel %vm81_vm0, %v77_v23, 0.0  ;;  %v83_v28 = vsel %vm81_vm0, %v78_v24, 0.0  ;;  %v85_v29 = vsel %vm81_vm0, %v79_v25, 0.0  ;;  %94 = vst [vmem:[#allocation1 + $0x10] ss:$2 sm:$0xff] %v63_v10  ;;  %v87_v31 = vsel %vm81_vm0, %v80_v26, 0.0 }
  0x1a   :  { %v84_v30 = vadd.f32 %v83_v28, %v82_v27 }
  0x1c   :  { %v86_v32 = vadd.f32 %v85_v29, %v84_v30 }
  0x1e   :  { %v88_v33 = vadd.f32 %v87_v31, %v86_v32 }
  0x1f   :  { %v95_v34 = vld.sshfl [vmem:[#allocation1] sm:$0xff pattern:$0x75316420]  ;;  %v96_v35 = vld.sshfl [vmem:[#allocation1 + $0x8] sm:$0xff pattern:$0x75316420] }
  0x20   :  { %89 = vadd.xlane.f32.xlu0 %v88_v33  ;;  %v97_v36 = vld.sshfl [vmem:[#allocation1 + $0x10] sm:$0xff pattern:$0x75316420]  ;;  %v98_v37 = vld.sshfl [vmem:[#allocation1 + $0x18] sm:$0xff pattern:$0x75316420] }
  0x21   :  { %v103_v38 = vsel %vm460_vm1, %v95_v34, 0.0  ;;  %v104_v39 = vsel %vm464_vm2, %v96_v35, 0.0  ;;  %v105_v40 = vsel %vm468_vm3, %v97_v36, 0.0  ;;  %v106_v41 = vsel %vm472_vm4, %v98_v37, 0.0 }
  0x22   :  { %v107_v42 = vsel %vm81_vm0, %v103_v38, 0.0  ;;  %v108_v43 = vsel %vm81_vm0, %v104_v39, 0.0  ;;  %v110_v44 = vsel %vm81_vm0, %v105_v40, 0.0  ;;  %v112_v46 = vsel %vm81_vm0, %v106_v41, 0.0 }
  0x23   :  { %v109_v45 = vadd.f32 %v108_v43, %v107_v42 }
  0x25   :  { %v111_v47 = vadd.f32 %v110_v44, %v109_v45  ;;  %v418_v45 = vmov 0  }
  0x26   :  { %328 = vset.pattern.permute.xlu1 %v418_v45 }
  0x27   :  { %v113_v48 = vadd.f32 %v112_v46, %v111_v47  ;;  %v419_v46 = vmov 2  }
  0x28   :  { %327 = vset.pattern.permute.xlu0 %v419_v46 }
  0x29   :  { %114 = vadd.xlane.f32.xlu0 %v113_v48 }
  0x93   :  { %v90_v49 = vpop.xlane.xlu0 %89 }
  0x94   :  { %v500_v51 = vmul.f32 0.001953125, %v90_v49 }
  0x9c   :  { %v115_v50 = vpop.xlane.xlu0 %114 }
  0x9d   :  { %v502_v52 = vmul.f32 0.001953125, %v115_v50 }
  0x9f   :  { %v118_v53 = vsel %vm464_vm2, %v502_v52, %v500_v51  ;;  %v120_v54 = vsel %vm472_vm4, %v502_v52, %v500_v51  ;;  %v117_v57 = vsel %vm460_vm1, %v502_v52, %v500_v51  ;;  %v119_v58 = vsel %vm468_vm3, %v502_v52, %v500_v51 }
  0xa0   :  { %v125_v55 = vrot.slane %v118_v53, 4  ;;  %v126_v56 = vrot.slane %v120_v54, 4 }
  0xa2   :  { %v127_v59 = vsel %vm81_vm0, %v117_v57, %v125_v55  ;;  %v128_v60 = vsel %vm81_vm0, %v119_v58, %v126_v56 }
  0xa3   :  { %v131_v61 = vsub.f32 %v448_v2, %v127_v59  ;;  %v132_v62 = vsub.f32 %v450_v3, %v128_v60  ;;  %v137_v63 = vsub.f32 %v452_v4, %v127_v59  ;;  %v138_v0 = vsub.f32 %v454_v8, %v128_v60 }
  0xa5   :  { %v133_v1 = vmul.f32 %v131_v61, %v131_v61  ;;  %v134_v5 = vmul.f32 %v132_v62, %v132_v62  ;;  %v139_v6 = vmul.f32 %v137_v63, %v137_v63  ;;  %v140_v7 = vmul.f32 %v138_v0, %v138_v0  ;;  %v195_v63 = vld [vmem:[#allocation2] sm:$0xf] }
  0xa7   :  { %v141_v9 = vadd.f32 %v139_v6, %v133_v1  ;;  %v142_v10 = vadd.f32 %v140_v7, %v134_v5 }
  0xa9   :  { %145 = vst [vmem:[#allocation1] ss:$2 sm:$0xff] %v141_v9 }
  0xaa   :  { %147 = vst [vmem:[#allocation1 + $0x10] ss:$2 sm:$0xff] %v142_v10 }
  0xb0   :  { %v148_v11 = vld.sshfl [vmem:[#allocation1] sm:$0xff pattern:$0x75316420]  ;;  %v149_v12 = vld.sshfl [vmem:[#allocation1 + $0x8] sm:$0xff pattern:$0x75316420] }
  0xb1   :  { %v150_v13 = vld.sshfl [vmem:[#allocation1 + $0x10] sm:$0xff pattern:$0x75316420]  ;;  %v151_v14 = vld.sshfl [vmem:[#allocation1 + $0x18] sm:$0xff pattern:$0x75316420] }
  0xb2   :  { %v156_v19 = vsel %vm460_vm1, 0.0, %v148_v11  ;;  %v157_v20 = vsel %vm464_vm2, 0.0, %v149_v12  ;;  %v158_v21 = vsel %vm468_vm3, 0.0, %v150_v13  ;;  %170 = vst [vmem:[#allocation1] ss:$2 sm:$0xff] %v141_v9  ;;  %v159_v24 = vsel %vm472_vm4, 0.0, %v151_v14 }
  0xb3   :  { %v160_v22 = vsel %vm81_vm0, %v156_v19, 0.0  ;;  %v161_v23 = vsel %vm81_vm0, %v157_v20, 0.0  ;;  %172 = vst [vmem:[#allocation1 + $0x10] ss:$2 sm:$0xff] %v142_v10  ;;  %v163_v26 = vsel %vm81_vm0, %v158_v21, 0.0  ;;  %v165_v28 = vsel %vm81_vm0, %v159_v24, 0.0 }
  0xb4   :  { %v162_v25 = vadd.f32 %v161_v23, %v160_v22  ;;  %v421_v20 = vmov 3   ;;  %v422_v21 = vmov 1  }
  0xb5   :  { %329 = vset.pattern.permute.xlu2 %v421_v20 }
  0xb6   :  { %v164_v27 = vadd.f32 %v163_v26, %v162_v25 }
  0xb8   :  { %v166_v29 = vadd.f32 %v165_v28, %v164_v27 }
  0xb9   :  { %v173_v30 = vld.sshfl [vmem:[#allocation1] sm:$0xff pattern:$0x75316420]  ;;  %v174_v31 = vld.sshfl [vmem:[#allocation1 + $0x8] sm:$0xff pattern:$0x75316420] }
  0xba   :  { %167 = vadd.xlane.f32.xlu1 %v166_v29  ;;  %v175_v32 = vld.sshfl [vmem:[#allocation1 + $0x10] sm:$0xff pattern:$0x75316420]  ;;  %v176_v33 = vld.sshfl [vmem:[#allocation1 + $0x18] sm:$0xff pattern:$0x75316420] }
  0xbb   :  { %v181_v34 = vsel %vm460_vm1, %v173_v30, 0.0  ;;  %v182_v35 = vsel %vm464_vm2, %v174_v31, 0.0  ;;  %v183_v36 = vsel %vm468_vm3, %v175_v32, 0.0  ;;  %v184_v39 = vsel %vm472_vm4, %v176_v33, 0.0 }
  0xbc   :  { %v185_v37 = vsel %vm81_vm0, %v181_v34, 0.0  ;;  %v186_v38 = vsel %vm81_vm0, %v182_v35, 0.0  ;;  %v188_v41 = vsel %vm81_vm0, %v183_v36, 0.0  ;;  %v190_v43 = vsel %vm81_vm0, %v184_v39, 0.0 }
  0xbd   :  { %v187_v40 = vadd.f32 %v186_v38, %v185_v37 }
  0xbf   :  { %v189_v42 = vadd.f32 %v188_v41, %v187_v40 }
  0xc1   :  { %v191_v44 = vadd.f32 %v190_v43, %v189_v42 }
  0xc3   :  { %192 = vadd.xlane.f32.xlu1 %v191_v44 }
 0x12d   :  { %v168_v47 = vpop.xlane.xlu1 %167 }
 0x12e   :  { %v169_v48 = vmul.f32 0.001953125, %v168_v47 }
 0x130   :  { %v196_v49 = vmax.f32 %v169_v48, 0.0 }
 0x132   :  { %v197_v50 = vadd.f32 1e-05, %v196_v49 }
 0x134   :  { %332 = vrsqrt.f32 %v197_v50  ;;  %vm204_vm6 = vweird.f32 %v197_v50 }
 0x136   :  { %v193_v53 = vpop.xlane.xlu1 %192 }
 0x137   :  { %v194_v54 = vmul.f32 0.001953125, %v193_v53 }
 0x139   :  { %v209_v55 = vmax.f32 %v194_v54, 0.0 }
 0x13a   :  { %v333_v56 = vpop.eup %332 }
 0x13b   :  { %v199_v57 = vmul.f32 %v333_v56, %v197_v50  ;;  %v210_v58 = vadd.f32 1e-05, %v209_v55  ;;  %vm205_vm5 = vweird.f32 %v333_v56 }
 0x13c   :  { %vm206_vm7 = vmor %vm204_vm6, %vm205_vm5 }
 0x13d   :  { %v200_v59 = vmul.f32 %v333_v56, %v199_v57  ;;  %334 = vrsqrt.f32 %v210_v58  ;;  %vm217_vm9 = vweird.f32 %v210_v58 }
 0x13f   :  { %v201_v60 = vmul.f32 0.5, %v200_v59 }
 0x141   :  { %v202_v61 = vsub.f32 1.5, %v201_v60 }
 0x143   :  { %v335_v62 = vpop.eup %334  ;;  %v203_v0 = vmul.f32 %v333_v56, %v202_v61 }
 0x144   :  { %v212_v1 = vmul.f32 %v335_v62, %v210_v58  ;;  %vm218_vm8 = vweird.f32 %v335_v62 }
 0x145   :  { %v207_v5 = vsel %vm206_vm7, %v333_v56, %v203_v0  ;;  %vm219_vm10 = vmor %vm217_vm9, %vm218_vm8 }
 0x146   :  { %v213_v6 = vmul.f32 %v335_v62, %v212_v1  ;;  %v208_v7 = vmul.f32 %v207_v5, %v195_v63 }
 0x148   :  { %v214_v9 = vmul.f32 0.5, %v213_v6  ;;  %241 = vperm.xlu1 %328, %v208_v7   ;;  %v222_v10 = vmul.f32 %v208_v7, %v500_v51 }
 0x14a   :  { %v215_v11 = vsub.f32 1.5, %v214_v9  ;;  %224 = vrot.lane.b32.xlu2 %v222_v10, %s420_s0 }
 0x14c   :  { %v216_v12 = vmul.f32 %v335_v62, %v215_v11 }
 0x14e   :  { %v220_v13 = vsel %vm219_vm10, %v335_v62, %v216_v12 }
 0x14f   :  { %v221_v14 = vmul.f32 %v220_v13, %v195_v63 }
 0x151   :  { %236 = vperm.xlu0 %327, %v221_v14   ;;  %v228_v19 = vmul.f32 %v221_v14, %v502_v52 }
 0x153   :  { %230 = vrot.lane.b32.xlu2 %v228_v19, %s420_s0 }
 0x159   :  { %331 = vset.pattern.permute.xlu0 %v422_v21 }
 0x1a4   :  { %v225_v22 = vpop.permute.xlu2 %224 }
 0x1a5   :  { %v227_v24 = vsub.f32 %v195_v63, %v225_v22 }
 0x1ad   :  { %v231_v23 = vpop.permute.xlu2 %230 }
 0x1ae   :  { %v233_v51 = vsub.f32 %v195_v63, %v231_v23 }
 0x1b0   :  { %250 = vperm.xlu2 %329, %v233_v51  }
 0x1b8   :  { %330 = vset.pattern.permute.xlu2 %v422_v21 }
 0x1b9   :  { %255 = vperm.xlu2 %330, %v227_v24  }
 0x1ba   :  { %v242_v26 = vpop.permute.xlu1 %241 }
 0x1c3   :  { %v237_v25 = vpop.permute.xlu0 %236 }
 0x1c4   :  { %v245_v28 = vsel %vm464_vm2, %v237_v25, %v242_v26  ;;  %v247_v52 = vsel %vm472_vm4, %v237_v25, %v242_v26  ;;  %v244_v31 = vsel %vm460_vm1, %v237_v25, %v242_v26  ;;  %v246_v32 = vsel %vm468_vm3, %v237_v25, %v242_v26 }
 0x1c5   :  { %v266_v29 = vrot.slane %v245_v28, 4  ;;  %v267_v30 = vrot.slane %v247_v52, 4 }
 0x1c7   :  { %v268_v33 = vsel %vm81_vm0, %v244_v31, %v266_v29  ;;  %v269_v34 = vsel %vm81_vm0, %v246_v32, %v267_v30 }
 0x1c8   :  { %v272_v38 = vmul.f32 %v268_v33, %v448_v2  ;;  %v273_v41 = vmul.f32 %v269_v34, %v450_v3  ;;  %v290_v42 = vmul.f32 %v268_v33, %v452_v4  ;;  %v291_v16 = vmul.f32 %v269_v34, %v454_v8 }
 0x20a   :  { %v251_v27 = vpop.permute.xlu2 %250 }
 0x213   :  { %v256_v35 = vpop.permute.xlu2 %255 }
 0x214   :  { %v259_v36 = vsel %vm464_vm2, %v251_v27, %v256_v35  ;;  %v261_v37 = vsel %vm472_vm4, %v251_v27, %v256_v35  ;;  %v258_v43 = vsel %vm460_vm1, %v251_v27, %v256_v35  ;;  %v260_v44 = vsel %vm468_vm3, %v251_v27, %v256_v35 }
 0x215   :  { %v278_v39 = vrot.slane %v259_v36, 4  ;;  %v279_v40 = vrot.slane %v261_v37, 4 }
 0x217   :  { %v280_v45 = vsel %vm81_vm0, %v258_v43, %v278_v39  ;;  %v281_v18 = vsel %vm81_vm0, %v260_v44, %v279_v40 }
 0x218   :  { %v284_v46 = vadd.f32 %v280_v45, %v272_v38  ;;  %v285_v2 = vadd.f32 %v281_v18, %v273_v41  ;;  %v292_v47 = vadd.f32 %v290_v42, %v280_v45  ;;  %v293_v3 = vadd.f32 %v291_v16, %v281_v18 }
 0x21a   :  { %286 = vst [vmem:[#allocation7] sm:$0xff] %v284_v46 }
 0x21b   :  { %287 = vst [vmem:[#allocation7 + $0x8] sm:$0xff] %v285_v2 }
 0x21c   :  { %295 = vst [vmem:[#allocation7 + $0x10] sm:$0xff] %v292_v47 }
 0x21d   :  { %296 = vst [vmem:[#allocation7 + $0x18] sm:$0xff] %v293_v3 }
 0x21e   :  { %309 = dma.vmem_to_hbm [thread:$0]  %s302_s21, 512, %s304_s24, [#allocation4], %s416_s19, %s416_s19, %s417_s20  }
 0x21f   :  { %412 = dma.done.wait [#allocation4], 512  }
 0x220   :  { %413 = vsyncadd [#allocation4], 4294966784 }
 0x221   :  { %314 = vsyncpa [#allocation3], 1 }
 0x222   :  { %315 = vsyncpa [#allocation6], 1 }
 0x223   :  { %316 = vsyncpa [#allocation4], 1 }

</bundles_post_ra>
